<compile_context>
chip_gen: v7x
topology: tpu7x:2x2x1
jax: 0.10.0
libtpu: 0.0.40
codegen_flags: <defaults>
</compile_context>

<pallas_src>
import functools

import jax
import jax.numpy as jnp
from jax.experimental import pallas as pl
from jax.experimental.pallas import tpu as pltpu


def _round_up(x, m):
    return (x + m - 1) // m * m


def _cdiv(a, b):
    return (a + b - 1) // b


def _mlp_kernel(x_ref, w1_ref, b1_ref, w2_ref, b2_ref, w3_ref, b3_ref, o_ref,
                *, compute_dtype, epilogue_dtype):
    # Cast the x tile in-kernel (no wrapper-side HBM cast pass).
    x = x_ref[...].astype(compute_dtype)
    # Layer 1: (bm, F) @ (F, 512) with f32 accumulation on the MXU.
    h = jnp.dot(x, w1_ref[...], preferred_element_type=jnp.float32)
    h = jnp.maximum(h.astype(epilogue_dtype) + b1_ref[...], 0.0).astype(compute_dtype)
    # Layer 2: (bm, 512) @ (512, 128).
    h = jnp.dot(h, w2_ref[...], preferred_element_type=jnp.float32)
    h = jnp.maximum(h.astype(epilogue_dtype) + b2_ref[...], 0.0).astype(compute_dtype)
    # Layer 3: (bm, 128) @ (128, 10); final bias add + store in f32 (10 lanes).
    out = jnp.dot(h, w3_ref[...], preferred_element_type=jnp.float32)
    o_ref[...] = (out + b3_ref[...]).astype(o_ref.dtype)


@functools.partial(jax.jit, static_argnames=("bm", "compute_dtype", "epilogue_dtype"))
def model_approximator_forward(x, w1, b1, w2, b2, w3, b3, *,
                               bm=2048,
                               compute_dtype=jnp.bfloat16,
                               epilogue_dtype=None):
    """Pallas forward pass of ModelApproximator.

    x : (N, arch_in_features + data_in_features) float32
    returns logits : (N, 10) float32

    compute_dtype  : matmul operand dtype (bf16 recommended on all TPU gens;
                     accumulation is always f32).
    epilogue_dtype : dtype for bias add + ReLU (None -> compute_dtype; use
                     jnp.float32 on v5e or for tighter accuracy).
    """
    n, f = x.shape
    h1d, h2d, out_dim = w1.shape[1], w2.shape[1], w3.shape[1]
    if epilogue_dtype is None:
        epilogue_dtype = compute_dtype

    # --- batch tile selection (no N padding; ragged last tile is masked). ---
    bm = max(8, _round_up(bm, 8))
    if n <= bm:
        bm_eff = n                      # one full-batch tile (full-dim block)
    else:
        bm_eff = bm                     # multiple of 8; last tile may be ragged
    # v7x has 2 TensorCores: prefer >= 2 grid steps when each tile still has
    # enough rows (>= ~512) to amortize the per-step overhead.
    if _cdiv(n, bm_eff) < 2 and n >= 1024:
        bm_eff = _round_up(_cdiv(n, 2), 8)
    grid = (_cdiv(n, bm_eff),)

    # Only the tiny, VMEM-resident weights are cast in the wrapper; x stays f32
    # in HBM and is cast per tile inside the kernel.
    w1 = w1.astype(compute_dtype)
    w2 = w2.astype(compute_dtype)
    w3 = w3.astype(compute_dtype)
    b1 = b1.astype(epilogue_dtype)
    b2 = b2.astype(epilogue_dtype)
    b3 = b3.astype(jnp.float32)

    kernel = functools.partial(_mlp_kernel,
                               compute_dtype=compute_dtype,
                               epilogue_dtype=epilogue_dtype)

    out = pl.pallas_call(
        kernel,
        out_shape=jax.ShapeDtypeStruct((n, out_dim), jnp.float32),
        grid_spec=pltpu.PrefetchScalarGridSpec(
            num_scalar_prefetch=0,
            grid=grid,
            in_specs=[
                pl.BlockSpec((bm_eff, f), lambda i: (i, 0)),      # x tile (true F)
                # Constant index_map => weights/biases are DMA'd once and stay
                # resident in VMEM for the whole grid (~165 KiB bf16 total).
                pl.BlockSpec((f, h1d), lambda i: (0, 0)),         # W1
                pl.BlockSpec((1, h1d), lambda i: (0, 0)),         # b1
                pl.BlockSpec((h1d, h2d), lambda i: (0, 0)),       # W2
                pl.BlockSpec((1, h2d), lambda i: (0, 0)),         # b2
                pl.BlockSpec((h2d, out_dim), lambda i: (0, 0)),   # W3
                pl.BlockSpec((1, out_dim), lambda i: (0, 0)),     # b3
            ],
            out_specs=pl.BlockSpec((bm_eff, out_dim), lambda i: (i, 0)),
        ),
        compiler_params=pltpu.CompilerParams(
            dimension_semantics=("parallel",),
        ),
    )(x, w1, b1, w2, b2, w3, b3)

    return out


def init_params(key, arch_in_features, data_in_features):
    """Deterministic synthetic init matching nn.Linear shapes (stored as (in, out))."""
    in_f = arch_in_features + data_in_features
    dims = [(in_f, 512), (512, 128), (128, 10)]
    params = []
    for d_in, d_out in dims:
        key, kw, kb = jax.random.split(key, 3)
        bound = 1.0 / jnp.sqrt(d_in)  # same scale as torch default init
        w = jax.random.uniform(kw, (d_in, d_out), jnp.float32, -bound, bound)
        b = jax.random.uniform(kb, (1, d_out), jnp.float32, -bound, bound)
        params += [w, b]
    return params


def _reference_forward(x, w1, b1, w2, b2, w3, b3):
    h = jnp.maximum(x @ w1 + b1, 0.0)
    h = jnp.maximum(h @ w2 + b2, 0.0)
    return h @ w3 + b3


if __name__ == "__main__":
    arch_in_features = 16
    data_in_features = 16
    feat = arch_in_features + data_in_features

    key = jax.random.PRNGKey(0)
    key, kx1, kx2, kx3 = jax.random.split(key, 4)
    w1, b1, w2, b2, w3, b3 = init_params(key, arch_in_features, data_in_features)

    # --- run 1: tiny batch, f32 matmuls + f32 epilogue, tight check vs JAX ref. ---
    x1 = jax.random.normal(kx1, (8, feat), jnp.float32)
    y1 = model_approximator_forward(x1, w1, b1, w2, b2, w3, b3,
                                    compute_dtype=jnp.float32,
                                    epilogue_dtype=jnp.float32)
    y1 = jax.block_until_ready(y1)
    r1 = _reference_forward(x1, w1, b1, w2, b2, w3, b3)
    assert y1.shape == (8, 10)
    assert jnp.allclose(y1, r1, atol=1e-4, rtol=1e-4), "f32 mismatch vs reference"

    # --- run 2: non-multiple-of-8 batch in a single full-batch tile, bf16
    #     matmul operands + bf16 epilogue (v6e/v7x fast path). ---
    x2 = jax.random.normal(kx2, (300, feat), jnp.float32)
    y2 = model_approximator_forward(x2, w1, b1, w2, b2, w3, b3)   # bf16 defaults
    y2 = jax.block_until_ready(y2)
    r2 = _reference_forward(x2, w1, b1, w2, b2, w3, b3)
    assert y2.shape == (300, 10)
    assert jnp.allclose(y2, r2, atol=3e-2, rtol=3e-2), "bf16 mismatch vs reference"

    # --- run 3: batch >= 1024 exercises the 2-step (megacore) split and the
    #     masked ragged last tile. ---
    x3 = jax.random.normal(kx3, (1111, feat), jnp.float32)
    y3 = model_approximator_forward(x3, w1, b1, w2, b2, w3, b3)   # bf16 defaults
    y3 = jax.block_until_ready(y3)
    r3 = _reference_forward(x3, w1, b1, w2, b2, w3, b3)
    assert y3.shape == (1111, 10)
    assert jnp.allclose(y3, r3, atol=3e-2, rtol=3e-2), "bf16 mismatch vs reference (ragged)"

    print("KERNEL_OK")
</pallas_src>

<mosaic_0001>
module attributes {stable_mosaic.version = 11 : i64} {
  func.func @_mlp_kernel(%arg0: i32, %arg1: memref<8x32xf32, #tpu.memory_space<vmem>>, %arg2: memref<32x512xf32, #tpu.memory_space<vmem>>, %arg3: memref<1x512xf32, #tpu.memory_space<vmem>>, %arg4: memref<512x128xf32, #tpu.memory_space<vmem>>, %arg5: memref<1x128xf32, #tpu.memory_space<vmem>>, %arg6: memref<128x10xf32, #tpu.memory_space<vmem>>, %arg7: memref<1x10xf32, #tpu.memory_space<vmem>>, %arg8: memref<8x10xf32, #tpu.memory_space<vmem>>) attributes {dimension_semantics = [#tpu.dimension_semantics<parallel>], iteration_bounds = array<i64: 1>, scalar_prefetch = 0 : i64, scratch_operands = 0 : i64, tpu.core_type = #tpu.core_type<tc>, window_params = [{transform_indices = @transform_0, window_bounds = array<i64: 8, 32>}, {pipeline_mode = #tpu.pipeline_mode<synchronous>, transform_indices = @transform_1, window_bounds = array<i64: 32, 512>}, {pipeline_mode = #tpu.pipeline_mode<synchronous>, transform_indices = @transform_2, window_bounds = array<i64: 1, 512>}, {pipeline_mode = #tpu.pipeline_mode<synchronous>, transform_indices = @transform_3, window_bounds = array<i64: 512, 128>}, {pipeline_mode = #tpu.pipeline_mode<synchronous>, transform_indices = @transform_4, window_bounds = array<i64: 1, 128>}, {pipeline_mode = #tpu.pipeline_mode<synchronous>, transform_indices = @transform_5, window_bounds = array<i64: 128, 10>}, {pipeline_mode = #tpu.pipeline_mode<synchronous>, transform_indices = @transform_6, window_bounds = array<i64: 1, 10>}, {transform_indices = @transform_7, window_bounds = array<i64: 8, 10>}]} {
    %c0 = arith.constant 0 : index
    %c0_0 = arith.constant 0 : index
    %0 = vector.load %arg1[%c0, %c0_0] : memref<8x32xf32, #tpu.memory_space<vmem>>, vector<8x32xf32>
    %c0_1 = arith.constant 0 : index
    %c0_2 = arith.constant 0 : index
    %1 = vector.load %arg2[%c0_1, %c0_2] : memref<32x512xf32, #tpu.memory_space<vmem>>, vector<32x512xf32>
    %cst = arith.constant dense<0.000000e+00> : vector<8x512xf32>
    %2 = tpu.matmul %0, %1, %cst {dimension_numbers = #tpu.dot_dimension_numbers<[1], [0], [0], [1], [0, 0, 1, 1], [], []>} : vector<8x32xf32>, vector<32x512xf32>, vector<8x512xf32> -> vector<8x512xf32>
    %c0_3 = arith.constant 0 : index
    %c0_4 = arith.constant 0 : index
    %3 = vector.load %arg3[%c0_3, %c0_4] : memref<1x512xf32, #tpu.memory_space<vmem>>, vector<1x512xf32>
    %4 = vector.broadcast %3 : vector<1x512xf32> to vector<8x512xf32>
    %5 = arith.addf %2, %4 : vector<8x512xf32>
    %cst_5 = arith.constant 0.000000e+00 : f32
    %6 = vector.broadcast %cst_5 : f32 to vector<8x512xf32>
    %7 = arith.maximumf %5, %6 : vector<8x512xf32>
    %c0_6 = arith.constant 0 : index
    %c0_7 = arith.constant 0 : index
    %8 = vector.load %arg4[%c0_6, %c0_7] : memref<512x128xf32, #tpu.memory_space<vmem>>, vector<512x128xf32>
    %cst_8 = arith.constant dense<0.000000e+00> : vector<8x128xf32>
    %9 = tpu.matmul %7, %8, %cst_8 {dimension_numbers = #tpu.dot_dimension_numbers<[1], [0], [0], [1], [0, 0, 1, 1], [], []>} : vector<8x512xf32>, vector<512x128xf32>, vector<8x128xf32> -> vector<8x128xf32>
    %c0_9 = arith.constant 0 : index
    %c0_10 = arith.constant 0 : index
    %10 = vector.load %arg5[%c0_9, %c0_10] : memref<1x128xf32, #tpu.memory_space<vmem>>, vector<1x128xf32>
    %11 = vector.broadcast %10 : vector<1x128xf32> to vector<8x128xf32>
    %12 = arith.addf %9, %11 : vector<8x128xf32>
    %cst_11 = arith.constant 0.000000e+00 : f32
    %13 = vector.broadcast %cst_11 : f32 to vector<8x128xf32>
    %14 = arith.maximumf %12, %13 : vector<8x128xf32>
    %c0_12 = arith.constant 0 : index
    %c0_13 = arith.constant 0 : index
    %15 = vector.load %arg6[%c0_12, %c0_13] : memref<128x10xf32, #tpu.memory_space<vmem>>, vector<128x10xf32>
    %cst_14 = arith.constant dense<0.000000e+00> : vector<8x10xf32>
    %16 = tpu.matmul %14, %15, %cst_14 {dimension_numbers = #tpu.dot_dimension_numbers<[1], [0], [0], [1], [0, 0, 1, 1], [], []>} : vector<8x128xf32>, vector<128x10xf32>, vector<8x10xf32> -> vector<8x10xf32>
    %c0_15 = arith.constant 0 : index
    %c0_16 = arith.constant 0 : index
    %17 = vector.load %arg7[%c0_15, %c0_16] : memref<1x10xf32, #tpu.memory_space<vmem>>, vector<1x10xf32>
    %18 = vector.broadcast %17 : vector<1x10xf32> to vector<8x10xf32>
    %19 = arith.addf %16, %18 : vector<8x10xf32>
    %c0_17 = arith.constant 0 : index
    %c0_18 = arith.constant 0 : index
    %20 = vector.load %arg8[%c0_17, %c0_18] : memref<8x10xf32, #tpu.memory_space<vmem>>, vector<8x10xf32>
    tpu.vector_store %arg8[%c0_17, %c0_18], %19 {strides = array<i32>} : memref<8x10xf32, #tpu.memory_space<vmem>>, vector<8x10xf32>,
    return
  }
  func.func @transform_0(%arg0: i32) -> (i32, i32) {
    %c0_i32 = arith.constant 0 : i32
    %c0_i32_0 = arith.constant 0 : i32
    return %arg0, %c0_i32 : i32, i32
  }
  func.func @transform_1(%arg0: i32) -> (i32, i32) {
    %c0_i32 = arith.constant 0 : i32
    %c0_i32_0 = arith.constant 0 : i32
    %c0_i32_1 = arith.constant 0 : i32
    return %c0_i32, %c0_i32_0 : i32, i32
  }
  func.func @transform_2(%arg0: i32) -> (i32, i32) {
    %c0_i32 = arith.constant 0 : i32
    %c0_i32_0 = arith.constant 0 : i32
    %c0_i32_1 = arith.constant 0 : i32
    return %c0_i32, %c0_i32_0 : i32, i32
  }
  func.func @transform_3(%arg0: i32) -> (i32, i32) {
    %c0_i32 = arith.constant 0 : i32
    %c0_i32_0 = arith.constant 0 : i32
    %c0_i32_1 = arith.constant 0 : i32
    return %c0_i32, %c0_i32_0 : i32, i32
  }
  func.func @transform_4(%arg0: i32) -> (i32, i32) {
    %c0_i32 = arith.constant 0 : i32
    %c0_i32_0 = arith.constant 0 : i32
    %c0_i32_1 = arith.constant 0 : i32
    return %c0_i32, %c0_i32_0 : i32, i32
  }
  func.func @transform_5(%arg0: i32) -> (i32, i32) {
    %c0_i32 = arith.constant 0 : i32
    %c0_i32_0 = arith.constant 0 : i32
    %c0_i32_1 = arith.constant 0 : i32
    return %c0_i32, %c0_i32_0 : i32, i32
  }
  func.func @transform_6(%arg0: i32) -> (i32, i32) {
    %c0_i32 = arith.constant 0 : i32
    %c0_i32_0 = arith.constant 0 : i32
    %c0_i32_1 = arith.constant 0 : i32
    return %c0_i32, %c0_i32_0 : i32, i32
  }
  func.func @transform_7(%arg0: i32) -> (i32, i32) {
    %c0_i32 = arith.constant 0 : i32
    %c0_i32_0 = arith.constant 0 : i32
    return %arg0, %c0_i32 : i32, i32
  }
}

</mosaic_0001>

<bundles_post_ra>
// kernel: model_approximator_forward.1
= control target key start
LH: loop header
LB: loop body
LE: loop exit
PB: predicated region body
PF: predicated region fallthrough
CT: control target
= control target key end

     0   :  { %12 = vsyncpa [#allocation3], 0  ;;  %s1021_s0 = inlined_call_operand.vmem [shape: f32[8,32], index: 0, kind: input, shape index: {}]   ;;  %s1022_s1 = inlined_call_operand.vmem [shape: f32[32,512], index: 1, kind: input, shape index: {}]   ;;  %s1023_s2 = inlined_call_operand.vmem [shape: f32[1,512], index: 2, kind: input, shape index: {}]   ;;  %s1024_s3 = inlined_call_operand.hbm [shape: f32[512,128], index: 3, kind: input, shape index: {}]   ;;  %s1025_s4 = inlined_call_operand.vmem [shape: f32[1,128], index: 4, kind: input, shape index: {}]   ;;  %s1026_s5 = inlined_call_operand.vmem [shape: f32[128,10], index: 5, kind: input, shape index: {}]   ;;  %s1027_s6 = inlined_call_operand.vmem [shape: f32[1,10], index: 6, kind: input, shape index: {}]   ;;  %s1028_s7 = inlined_call_operand.hbm [shape: f32[8,10], index: 7, kind: output, shape index: {}]  }
   0x1   :  { %13 = vsyncpa [#allocation4], 0  ;;  %s837_s24 = smov [#allocation2]   ;;  %s789_s28 = scalar_lea.hbm %s1024_s3, 8192 }
   0x2   :  { %s25_s25 = sshll.u32 %s837_s24, 4  ;;  %p790_p0 = scmp.ne.s32.totalorder %s1024_s3, %s789_s28  ;;  %s26_s25 = int_to_ptr.vmem [resolvable:$true] %s25_s25 }
   0x3   :  { %p793_p1 = scmp.lt.u32.totalorder %s789_s28, %s1024_s3 }
   0x5   :  { %p795_p2 = pnand %p793_p1, %p790_p0 }
   0x7   :  { %798 = shalt.err (!%p795_p2)
}
   0x8   :  { %s799_s10 = scalar_lea.vmem %s26_s25, 8192  ;;  %p804_p4 = scmp.lt.s32.totalorder %s26_s25, %s26_s25 }
   0x9   :  { %p800_p3 = scmp.ne.s32.totalorder %s26_s25, %s799_s10  ;;  %p805_p5 = scmp.lt.s32.totalorder %s799_s10, %s799_s10 }
   0xb   :  { %p806_p6 = por %p805_p5, %p804_p4 }
   0xd   :  { %p807_p7 = pnand %p806_p6, %p800_p3 }
   0xf   :  { %810 = shalt.err (!%p807_p7)
}
  0x10   :  { %s838_s11 = smov 128   ;;  %s839_s12 = smov 8  }
  0x11   :  { %31 = dma.hbm_to_vmem [thread:$0]  %s1024_s3, 8192, %s26_s25, [#allocation3], %s838_s11, %s838_s11, %s839_s12  }
  0x12   :  { %833 = dma.done.wait [#allocation3], 8192  }
  0x13   :  { %834 = vsyncadd [#allocation3], 4294959104  ;;  %v840_v0 = vmov 0.0   ;;  %v43_v1 = vld [vmem:[%s1022_s1 + $0x8] sm:$0xff]  ;;  %v42_v3 = vld [vmem:[%s1022_s1] sm:$0xff]  ;;  %vm80_vm0 = vcmask 261120  }
  0x14   :  { %148 = vmatprep.mubr.f32.mxu1 %v840_v0  ;;  %v47_v2 = vld [vmem:[%s1022_s1 + $0x28] sm:$0xff]  ;;  %v46_v5 = vld [vmem:[%s1022_s1 + $0x20] sm:$0xff]  ;;  %v45_v12 = vld [vmem:[%s1022_s1 + $0x18] sm:$0xff]  ;;  %vm842_vm1 = vmmov 0   ;;  %s843_s8 = smov [#allocation5]   ;;  %vm535_vm2 = vcmask 80896  }
  0x15   :  { %v678_v4 = vpack.c.bf16 %v47_v2, %v43_v1  ;;  %v51_v6 = vld [vmem:[%s1022_s1 + $0x48] sm:$0xff]  ;;  %v680_v8 = vpack.c.bf16 %v46_v5, %v42_v3  ;;  %v50_v10 = vld [vmem:[%s1022_s1 + $0x40] sm:$0xff]  ;;  %v49_v13 = vld [vmem:[%s1022_s1 + $0x38] sm:$0xff]  ;;  %s543_s9 = sshll.u32 %s843_s8, 4  ;;  %s544_s9 = int_to_ptr.vmem [resolvable:$true] %s543_s9 }
  0x16   :  { %v55_v7 = vld [vmem:[%s1022_s1 + $0x68] sm:$0xff]  ;;  %v54_v11 = vld [vmem:[%s1022_s1 + $0x60] sm:$0xff]  ;;  %v44_v15 = vld [vmem:[%s1022_s1 + $0x10] sm:$0xff]  ;;  %v686_v17 = vpack.c.bf16 %v49_v13, %v45_v12  ;;  %p816_p9 = scmp.lt.s32.totalorder %s544_s9, %s544_s9 }
  0x17   :  { %v682_v9 = vpack.c.bf16 %v55_v7, %v51_v6  ;;  %679 = vmatprep.subr.bf16.mxu1 %v678_v4  ;;  %v684_v14 = vpack.c.bf16 %v54_v11, %v50_v10  ;;  %v48_v16 = vld [vmem:[%s1022_s1 + $0x30] sm:$0xff]  ;;  %v53_v18 = vld [vmem:[%s1022_s1 + $0x58] sm:$0xff]  ;;  %v246_v20 = vld [vmem:[#allocation2 + $0x80] sm:$0xff] }
  0x18   :  { %681 = vmatpush1.bf16.msra.mxu1 %v680_v8  ;;  %v57_v19 = vld [vmem:[%s1022_s1 + $0x78] sm:$0xff]  ;;  %v41_v21 = vld [vmem:[%s1021_s0] sm:$0xff]  ;;  %v247_v22 = vld [vmem:[#allocation2 + $0x88] sm:$0xff]  ;;  %v688_v30 = vpack.c.bf16 %v48_v16, %v44_v15 }
  0x19   :  { %683 = vmatprep.subr.bf16.mxu1 %v682_v9  ;;  %v230_v23 = vld [vmem:[#allocation2] sm:$0xff]  ;;  %v231_v24 = vld [vmem:[#allocation2 + $0x8] sm:$0xff]  ;;  %v694_v25 = vpack.c.bf16 %v247_v22, %v246_v20  ;;  %v248_v27 = vld [vmem:[#allocation2 + $0x90] sm:$0xff]  ;;  %v690_v35 = vpack.c.bf16 %v57_v19, %v53_v18 }
  0x1a   :  { %v696_v26 = vpack.c.bf16 %v231_v24, %v230_v23  ;;  %v249_v28 = vld [vmem:[#allocation2 + $0x98] sm:$0xff]  ;;  %v232_v29 = vld [vmem:[#allocation2 + $0x10] sm:$0xff]  ;;  %v250_v33 = vld [vmem:[#allocation2 + $0xa0] sm:$0xff] }
  0x1b   :  { %v698_v31 = vpack.c.bf16 %v249_v28, %v248_v27  ;;  %v233_v32 = vld [vmem:[#allocation2 + $0x18] sm:$0xff]  ;;  %v251_v34 = vld [vmem:[#allocation2 + $0xa8] sm:$0xff]  ;;  %v52_v36 = vld [vmem:[%s1022_s1 + $0x50] sm:$0xff]  ;;  %695 = vmatprep.subr.bf16.mxu0 %v694_v25 }
  0x1c   :  { %685 = vmatpush1.bf16.msra.mxu1 %v684_v14  ;;  %v56_v37 = vld [vmem:[%s1022_s1 + $0x70] sm:$0xff]  ;;  %697 = vmatpush3.bf16.msra.mxu0 %v696_v26  ;;  %v700_v38 = vpack.c.bf16 %v233_v32, %v232_v29  ;;  %v278_v39 = vld [vmem:[#allocation2 + $0x180] sm:$0xff]  ;;  %v279_v40 = vld [vmem:[#allocation2 + $0x188] sm:$0xff]  ;;  %v702_v41 = vpack.c.bf16 %v251_v34, %v250_v33 }
  0x1d   :  { %687 = vmatprep.subr.bf16.mxu1 %v686_v17  ;;  %699 = vmatprep.subr.bf16.mxu0 %v698_v31  ;;  %v234_v42 = vld [vmem:[#allocation2 + $0x20] sm:$0xff]  ;;  %v235_v43 = vld [vmem:[#allocation2 + $0x28] sm:$0xff]  ;;  %v692_v44 = vpack.c.bf16 %v56_v37, %v52_v36  ;;  %v252_v45 = vld [vmem:[#allocation2 + $0xb0] sm:$0xff]  ;;  %v726_v47 = vpack.c.bf16 %v279_v40, %v278_v39 }
  0x1e   :  { %v253_v46 = vld [vmem:[#allocation2 + $0xb8] sm:$0xff]  ;;  %v262_v48 = vld [vmem:[#allocation2 + $0x100] sm:$0xff]  ;;  %v263_v49 = vld [vmem:[#allocation2 + $0x108] sm:$0xff]  ;;  %v704_v50 = vpack.c.bf16 %v235_v43, %v234_v42 }
  0x1f   :  { %552 = vmatmul.mubr.msk.f32.vlgmr.msra.gmra.mrb[0].mxu1 %vm80_vm0, %v41_v21  ;;  %v280_v51 = vld [vmem:[#allocation2 + $0x190] sm:$0xff]  ;;  %v281_v52 = vld [vmem:[#allocation2 + $0x198] sm:$0xff]  ;;  %v706_v53 = vpack.c.bf16 %v253_v46, %v252_v45  ;;  %v728_v56 = vpack.c.bf16 %v263_v49, %v262_v48  ;;  %v254_v57 = vld [vmem:[#allocation2 + $0xc0] sm:$0xff] }
  0x20   :  { %689 = vmatpush1.bf16.msra.mxu1 %v688_v30  ;;  %219 = vmatprep.mubr.f32.mxu1 %v840_v0  ;;  %v236_v54 = vld [vmem:[#allocation2 + $0x30] sm:$0xff]  ;;  %v237_v55 = vld [vmem:[#allocation2 + $0x38] sm:$0xff]  ;;  %v255_v58 = vld [vmem:[#allocation2 + $0xc8] sm:$0xff]  ;;  %v730_v59 = vpack.c.bf16 %v281_v52, %v280_v51 }
  0x21   :  { %691 = vmatprep.subr.bf16.mxu1 %v690_v35  ;;  %701 = vmatpush3.bf16.msra.mxu0 %v700_v38  ;;  %v264_v60 = vld [vmem:[#allocation2 + $0x110] sm:$0xff]  ;;  %v265_v61 = vld [vmem:[#allocation2 + $0x118] sm:$0xff]  ;;  %v708_v62 = vpack.c.bf16 %v237_v55, %v236_v54  ;;  %v282_v63 = vld [vmem:[#allocation2 + $0x1a0] sm:$0xff]  ;;  %v710_v2 = vpack.c.bf16 %v255_v58, %v254_v57 }
  0x22   :  { %703 = vmatprep.subr.bf16.mxu0 %v702_v41  ;;  %v283_v1 = vld [vmem:[#allocation2 + $0x1a8] sm:$0xff]  ;;  %v238_v3 = vld [vmem:[#allocation2 + $0x40] sm:$0xff]  ;;  %v732_v5 = vpack.c.bf16 %v265_v61, %v264_v60  ;;  %v256_v6 = vld [vmem:[#allocation2 + $0xd0] sm:$0xff]  ;;  %v60_v60 = vlaneseq }
  0x23   :  { %v239_v4 = vld [vmem:[#allocation2 + $0x48] sm:$0xff]  ;;  %v257_v7 = vld [vmem:[#allocation2 + $0xd8] sm:$0xff]  ;;  %v734_v8 = vpack.c.bf16 %v283_v1, %v282_v63  ;;  %v266_v9 = vld [vmem:[#allocation2 + $0x120] sm:$0xff] }
  0x24   :  { %693 = vmatpush1.bf16.msra.mxu1 %v692_v44  ;;  %v267_v10 = vld [vmem:[#allocation2 + $0x128] sm:$0xff]  ;;  %v712_v11 = vpack.c.bf16 %v239_v4, %v238_v3  ;;  %v284_v12 = vld [vmem:[#allocation2 + $0x1b0] sm:$0xff]  ;;  %v285_v13 = vld [vmem:[#allocation2 + $0x1b8] sm:$0xff]  ;;  %v714_v14 = vpack.c.bf16 %v257_v7, %v256_v6  ;;  %v61_v61 = vshrl.u32 %v60_v60, 7 }
  0x25   :  { %727 = vmatprep.subr.bf16.mxu1 %v726_v47  ;;  %705 = vmatpush3.bf16.msra.mxu0 %v704_v50  ;;  %v240_v15 = vld [vmem:[#allocation2 + $0x50] sm:$0xff]  ;;  %v241_v16 = vld [vmem:[#allocation2 + $0x58] sm:$0xff]  ;;  %v736_v17 = vpack.c.bf16 %v267_v10, %v266_v9  ;;  %v258_v18 = vld [vmem:[#allocation2 + $0xe0] sm:$0xff]  ;;  %v738_v20 = vpack.c.bf16 %v285_v13, %v284_v12 }
  0x26   :  { %707 = vmatprep.subr.bf16.mxu0 %v706_v53  ;;  %v259_v19 = vld [vmem:[#allocation2 + $0xe8] sm:$0xff]  ;;  %v269_v22 = vld [vmem:[#allocation2 + $0x138] sm:$0xff]  ;;  %v716_v23 = vpack.c.bf16 %v241_v16, %v240_v15  ;;  %v286_v24 = vld [vmem:[#allocation2 + $0x1c0] sm:$0xff]  ;;  %v66_v1 = vsub.s32 1, %v61_v61  ;;  %v70_v7 = vsub.s32 2, %v61_v61 }
  0x27   :  { %553 = vmatmul.mubr.msk.f32.vlgmr.msra.gmra.mrb[2].mxu1 %vm80_vm0, %v41_v21  ;;  %v268_v21 = vld [vmem:[#allocation2 + $0x130] sm:$0xff]  ;;  %v287_v25 = vld [vmem:[#allocation2 + $0x1c8] sm:$0xff]  ;;  %v718_v26 = vpack.c.bf16 %v259_v19, %v258_v18  ;;  %v242_v29 = vld [vmem:[#allocation2 + $0x60] sm:$0xff] }
  0x28   :  { %729 = vmatpush3.bf16.msra.mxu1 %v728_v56  ;;  %v740_v27 = vpack.c.bf16 %v269_v22, %v268_v21  ;;  %v742_v28 = vpack.c.bf16 %v287_v25, %v286_v24  ;;  %v243_v30 = vld [vmem:[#allocation2 + $0x68] sm:$0xff]  ;;  %v270_v31 = vld [vmem:[#allocation2 + $0x140] sm:$0xff]  ;;  %v260_v35 = vld [vmem:[#allocation2 + $0xf0] sm:$0xff] }
  0x29   :  { %731 = vmatprep.subr.bf16.mxu1 %v730_v59  ;;  %709 = vmatpush3.bf16.msra.mxu0 %v708_v62  ;;  %v720_v32 = vpack.c.bf16 %v243_v30, %v242_v29  ;;  %v271_v33 = vld [vmem:[#allocation2 + $0x148] sm:$0xff]  ;;  %v261_v36 = vld [vmem:[#allocation2 + $0xf8] sm:$0xff]  ;;  %v288_v37 = vld [vmem:[#allocation2 + $0x1d0] sm:$0xff]  ;;  %v841_v59 = vmov 0.0|0.0   ;;  %v62_v62 = vsub.s32 0, %v61_v61 }
  0x2a   :  { %711 = vmatprep.subr.bf16.mxu0 %v710_v2  ;;  %v744_v34 = vpack.c.bf16 %v271_v33, %v270_v31  ;;  %v722_v38 = vpack.c.bf16 %v261_v36, %v260_v35  ;;  %v289_v39 = vld [vmem:[#allocation2 + $0x1d8] sm:$0xff]  ;;  %v244_v40 = vld [vmem:[#allocation2 + $0x70] sm:$0xff]  ;;  %v290_v47 = vld [vmem:[#allocation2 + $0x1e0] sm:$0xff] }
  0x2b   :  { %v245_v41 = vld [vmem:[#allocation2 + $0x78] sm:$0xff]  ;;  %v746_v42 = vpack.c.bf16 %v289_v39, %v288_v37  ;;  %v272_v44 = vld [vmem:[#allocation2 + $0x150] sm:$0xff]  ;;  %v291_v48 = vld [vmem:[#allocation2 + $0x1e8] sm:$0xff] }
  0x2c   :  { %733 = vmatpush3.bf16.msra.mxu1 %v732_v5  ;;  %v724_v43 = vpack.c.bf16 %v245_v41, %v244_v40  ;;  %v273_v45 = vld [vmem:[#allocation2 + $0x158] sm:$0xff]  ;;  %v750_v49 = vpack.c.bf16 %v291_v48, %v290_v47  ;;  %v274_v50 = vld [vmem:[#allocation2 + $0x160] sm:$0xff]  ;;  %v275_v51 = vld [vmem:[#allocation2 + $0x168] sm:$0xff] }
  0x2d   :  { %735 = vmatprep.subr.bf16.mxu1 %v734_v8  ;;  %713 = vmatpush3.bf16.msra.mxu0 %v712_v11  ;;  %v748_v46 = vpack.c.bf16 %v273_v45, %v272_v44  ;;  %v752_v52 = vpack.c.bf16 %v275_v51, %v274_v50  ;;  %v292_v53 = vld [vmem:[#allocation2 + $0x1f0] sm:$0xff]  ;;  %v293_v54 = vld [vmem:[#allocation2 + $0x1f8] sm:$0xff]  ;;  %v58_v63 = vld [vmem:[%s1023_s2] sm:$0xf]  ;;  %v74_v11 = vsub.s32 3, %v61_v61 }
  0x2e   :  { %715 = vmatprep.subr.bf16.mxu0 %v714_v14  ;;  %v754_v55 = vpack.c.bf16 %v293_v54, %v292_v53  ;;  %v276_v56 = vld [vmem:[#allocation2 + $0x170] sm:$0xff]  ;;  %v277_v57 = vld [vmem:[#allocation2 + $0x178] sm:$0xff]  ;;  %v63_v2 = vrot.slane %v58_v63, %v62_v62  ;;  %v67_v3 = vrot.slane %v58_v63, %v66_v1  ;;  %v442_v8 = vld [vmem:[%s1026_s5] sm:$0xff]  ;;  %v71_v15 = vrot.slane %v58_v63, %v70_v7 }
  0x2f   :  { %v756_v58 = vpack.c.bf16 %v277_v57, %v276_v56  ;;  %v443_v9 = vld [vmem:[%s1026_s5 + $0x8] sm:$0xff]  ;;  %v444_v16 = vld [vmem:[%s1026_s5 + $0x10] sm:$0xff]  ;;  %v75_v18 = vrot.slane %v58_v63, %v74_v11  ;;  %v449_v30 = vld [vmem:[%s1026_s5 + $0x38] sm:$0xff] }
  0x30   :  { %737 = vmatpush3.bf16.msra.mxu1 %v736_v17  ;;  %v759_v14 = vpack.c.bf16 %v443_v9, %v442_v8  ;;  %v445_v17 = vld [vmem:[%s1026_s5 + $0x18] sm:$0xff]  ;;  %v447_v24 = vld [vmem:[%s1026_s5 + $0x28] sm:$0xff]  ;;  %v448_v29 = vld [vmem:[%s1026_s5 + $0x30] sm:$0xff] }
  0x31   :  { %739 = vmatprep.subr.bf16.mxu1 %v738_v20  ;;  %717 = vmatpush3.bf16.msra.mxu0 %v716_v23  ;;  %v762_v20 = vpack.c.bf16 %v445_v17, %v444_v16  ;;  %v446_v23 = vld [vmem:[%s1026_s5 + $0x20] sm:$0xff]  ;;  %v768_v31 = vpack.c.bf16 %v449_v30, %v448_v29  ;;  %v451_v33 = vld [vmem:[%s1026_s5 + $0x48] sm:$0xff]  ;;  %v452_v35 = vld [vmem:[%s1026_s5 + $0x50] sm:$0xff] }
  0x32   :  { %719 = vmatprep.subr.bf16.mxu0 %v718_v26  ;;  %v453_v36 = vld [vmem:[%s1026_s5 + $0x58] sm:$0xff]  ;;  %v455_v39 = vld [vmem:[%s1026_s5 + $0x68] sm:$0xff]  ;;  %v456_v41 = vld [vmem:[%s1026_s5 + $0x70] sm:$0xff] }
  0x33   :  { %v774_v37 = vpack.c.bf16 %v453_v36, %v452_v35  ;;  %v554_v47 = vld [vmem:[%s1025_s4] ss:$0 sm:$0xff]  ;;  %s811_s4 = scalar_lea.vmem %s544_s9, 128 }
  0x34   :  { %741 = vmatpush3.bf16.msra.mxu1 %v740_v27  ;;  %v765_v27 = vpack.c.bf16 %v447_v24, %v446_v23  ;;  %v555_v54 = vld [vmem:[%s1027_s6] ss:$0 sm:$0xff]  ;;  %p812_p8 = scmp.ne.s32.totalorder %s544_s9, %s811_s4  ;;  %p817_p10 = scmp.lt.s32.totalorder %s811_s4, %s811_s4 }
  0x35   :  { %743 = vmatprep.subr.bf16.mxu1 %v742_v28  ;;  %721 = vmatpush3.bf16.msra.mxu0 %v720_v32  ;;  %v450_v32 = vld [vmem:[%s1026_s5 + $0x40] sm:$0xff] }
  0x36   :  { %723 = vmatprep.subr.bf16.mxu0 %v722_v38  ;;  %v454_v38 = vld [vmem:[%s1026_s5 + $0x60] sm:$0xff]  ;;  %p818_p11 = por %p817_p10, %p816_p9 }
  0x37   :  { %v777_v40 = vpack.c.bf16 %v455_v39, %v454_v38 }
  0x38   :  { %745 = vmatpush3.bf16.msra.mxu1 %v744_v34  ;;  %v771_v34 = vpack.c.bf16 %v451_v33, %v450_v32  ;;  %p819_p12 = pnand %p818_p11, %p812_p8 }
  0x39   :  { %747 = vmatprep.subr.bf16.mxu1 %v746_v42  ;;  %725 = vmatpush3.bf16.msra.mxu0 %v724_v43  ;;  %v457_v42 = vld [vmem:[%s1026_s5 + $0x78] sm:$0xff] }
  0x3a   :  { %758 = vmatprep.subr.bf16.mxu0 %v841_v59  ;;  %v780_v43 = vpack.c.bf16 %v457_v42, %v456_v41 }
  0x3c   :  { %749 = vmatpush3.bf16.msra.mxu1 %v748_v46 }
  0x3d   :  { %751 = vmatprep.subr.bf16.mxu1 %v750_v49 }
  0x40   :  { %753 = vmatpush3.bf16.msra.mxu1 %v752_v52 }
  0x41   :  { %755 = vmatprep.subr.bf16.mxu1 %v754_v55 }
  0x44   :  { %757 = vmatpush3.bf16.msra.mxu1 %v756_v58 }
  0xf2   :  { %v150_v4 = vpop.f32.mrb[0].mxu1 }
  0xf3   :  { %v151_v5 = vadd.f32 %v150_v4, %v63_v2  ;;  %v152_v6 = vpop.f32.mrb[1].mxu1 }
  0xf4   :  { %v153_v10 = vadd.f32 %v152_v6, %v67_v3 }
  0xf5   :  { %v226_v12 = vmax.f32 %v151_v5, 0.0 }
  0xf6   :  { %v227_v13 = vmax.f32 %v153_v10, 0.0 }
  0xf8   :  { %365 = vmatprep.mubr.f32.mxu0 %v227_v13 }
  0xf9   :  { %366 = vmatmul.mubr.f32.vlgmr.msra.gmra.mrb[0].mxu0 %v226_v12 }
  0xfa   :  { %v221_v19 = vpop.f32.mrb[2].mxu1  ;;  %760 = vmatpush3.bf16.msra.mxu0 %v759_v14  ;;  %675 = vmatprep.mubr.msk.f32.mxu0 %vm842_vm1, %v840_v0 }
  0xfb   :  { %v222_v21 = vadd.f32 %v221_v19, %v71_v15  ;;  %v223_v22 = vpop.f32.mrb[3].mxu1  ;;  %761 = vmatprep.subr.bf16.mxu0 %v841_v59 }
  0xfc   :  { %v224_v25 = vadd.f32 %v223_v22, %v75_v18 }
  0xfd   :  { %v228_v28 = vmax.f32 %v222_v21, 0.0 }
  0xfe   :  { %v229_v26 = vmax.f32 %v224_v25, 0.0  ;;  %763 = vmatpush3.bf16.msra.mxu0 %v762_v20 }
  0xff   :  { %764 = vmatprep.subr.bf16.mxu0 %v841_v59 }
 0x100   :  { %435 = vmatprep.mubr.f32.mxu1 %v229_v26 }
 0x101   :  { %436 = vmatmul.mubr.f32.vlgmr.msra.gmra.mrb[4].mxu1 %v228_v28 }
 0x102   :  { %766 = vmatpush3.bf16.msra.mxu0 %v765_v27 }
 0x103   :  { %767 = vmatprep.subr.bf16.mxu0 %v841_v59 }
 0x106   :  { %769 = vmatpush3.bf16.msra.mxu0 %v768_v31 }
 0x107   :  { %770 = vmatprep.subr.bf16.mxu0 %v841_v59 }
 0x10a   :  { %772 = vmatpush3.bf16.msra.mxu0 %v771_v34 }
 0x10b   :  { %773 = vmatprep.subr.bf16.mxu0 %v841_v59 }
 0x10e   :  { %775 = vmatpush3.bf16.msra.mxu0 %v774_v37 }
 0x10f   :  { %776 = vmatprep.subr.bf16.mxu0 %v841_v59 }
 0x112   :  { %778 = vmatpush3.bf16.msra.mxu0 %v777_v40 }
 0x113   :  { %779 = vmatprep.subr.bf16.mxu0 %v841_v59 }
 0x116   :  { %781 = vmatpush3.bf16.msra.mxu0 %v780_v43 }
 0x1cc   :  { %v588_v44 = vpop.f32.mrb[0].mxu0 }
 0x1cd   :  { %v589_v45 = vpop.f32.mrb[1].mxu0 }
 0x1ce   :  { %v590_v46 = vadd.f32 %v589_v45, %v588_v44 }
 0x1d0   :  { %v368_v50 = vadd.f32 %v590_v46, %v554_v47 }
 0x1d4   :  { %v623_v48 = vpop.f32.mrb[4].mxu1 }
 0x1d5   :  { %v624_v49 = vpop.f32.mrb[5].mxu1 }
 0x1d6   :  { %v625_v51 = vadd.f32 %v624_v49, %v623_v48 }
 0x1d8   :  { %v438_v52 = vadd.f32 %v625_v51, %v368_v50 }
 0x1da   :  { %v441_v53 = vmax.f32 %v438_v52, 0.0 }
 0x1dc   :  { %676 = vmatmul.mubr.f32.vlgmr.msra.gmra.mrb[2].mxu0 %v441_v53 }
 0x2af   :  { %v531_v0 = vpop.f32.mrb[2].mxu0 }
 0x2b0   :  { %v532_v55 = vadd.f32 %v555_v54, %v531_v0  ;;  %v677_v56 = vpop.f32.mrb[3].mxu0 }
 0x2b2   :  { %536 = vst.msk [vmem:[#allocation5] sm:$0xff] %vm535_vm2, %v532_v55 }
 0x2b3   :  { %822 = shalt.err (!%p819_p12)
}
 0x2b4   :  { %s823_s12 = scalar_lea.hbm %s1028_s7, 128 }
 0x2b5   :  { %p824_p13 = scmp.ne.s32.totalorder %s1028_s7, %s823_s12  ;;  %p827_p0 = scmp.lt.u32.totalorder %s823_s12, %s1028_s7 }
 0x2b7   :  { %p829_p1 = pnand %p827_p0, %p824_p13 }
 0x2b9   :  { %832 = shalt.err (!%p829_p1)
}
 0x2ba   :  { %546 = dma.vmem_to_hbm [thread:$0]  %s544_s9, 128, %s1028_s7, [#allocation4]  }
 0x2bb   :  { %835 = dma.done.wait [#allocation4], 128  }
 0x2bc   :  { %836 = vsyncadd [#allocation4], 4294967168 }
 0x2bd   :  { %550 = vsyncpa [#allocation3], 1 }
 0x2be   :  { %551 = vsyncpa [#allocation4], 1 }

</bundles_post_ra>
